<compile_context>
chip_gen: v7x
topology: tpu7x:2x2x1
jax: 0.10.0
libtpu: 0.0.40
codegen_flags: <defaults>
</compile_context>

<pallas_src>
import functools

import jax
import jax.numpy as jnp
from jax.experimental import pallas as pl
from jax.experimental.pallas import tpu as pltpu


LANE = 128           # output padded to a lane-dense 128 columns (unmasked vst)
MAX_TILE_B = 8192    # batch-tile cap; feature dims are tiny so VMEM ~ linear in B
MIN_TILE_B = 16      # bf16 sublane-packing friendly row multiple


def _round_up(x, m):
    return (x + m - 1) // m * m


def caddienet_kernel(x_ref, w1_ref, b1_ref, w2_ref, b2_ref, w3_ref, b3_ref,
                     o_ref):
    """One (TILE_B, input_dim) bf16 slab of x -> one (TILE_B, LANE) bf16 slab."""
    x = x_ref[...]                                    # already bf16 (wrapper cast)

    h1 = jnp.dot(x, w1_ref[...], preferred_element_type=jnp.float32)
    h1 = jnp.maximum(h1 + b1_ref[...], 0.0)           # f32 bias-add / ReLU (VPU)

    h2 = jnp.dot(h1.astype(jnp.bfloat16), w2_ref[...],
                 preferred_element_type=jnp.float32)
    h2 = jnp.maximum(h2 + b2_ref[...], 0.0)

    out = jnp.dot(h2.astype(jnp.bfloat16), w3_ref[...],
                  preferred_element_type=jnp.float32)
    o_ref[...] = (out + b3_ref[...]).astype(o_ref.dtype)   # bf16 writeback


def prepare_params(params):
    """One-time weight prep, hoisted out of the per-call path:
       bf16 weights, f32 biases, final layer zero-padded to LANE columns."""
    w1, b1 = params["w1"], params["b1"]
    w2, b2 = params["w2"], params["b2"]
    w3, b3 = params["w3"], params["b3"]
    hidden_dim, output_dim = w3.shape

    out_pad = _round_up(output_dim, LANE)
    w3p = jnp.zeros((hidden_dim, out_pad), w3.dtype).at[:, :output_dim].set(w3)
    b3p = jnp.zeros((1, out_pad), b3.dtype).at[:, :output_dim].set(b3)

    prepped = {
        "w1": w1.astype(jnp.bfloat16), "b1": b1.astype(jnp.float32),
        "w2": w2.astype(jnp.bfloat16), "b2": b2.astype(jnp.float32),
        "w3": w3p.astype(jnp.bfloat16), "b3": b3p.astype(jnp.float32),
    }
    return prepped, output_dim


@functools.partial(jax.jit, static_argnames=("output_dim",))
def caddienet_forward(x, prepped, output_dim):
    """x: (batch, input_dim) float32. prepped: output of prepare_params."""
    w1b, b1f = prepped["w1"], prepped["b1"]
    w2b, b2f = prepped["w2"], prepped["b2"]
    w3b, b3f = prepped["w3"], prepped["b3"]

    batch, input_dim = x.shape
    hidden_dim = w1b.shape[1]
    out_pad = w3b.shape[1]

    # ---- batch tiling: cdiv-based split bounds padding to <MIN_TILE_B rows per
    #      tile; force >=2 grid steps when batch allows it (v7x second TC) ----
    num_tiles = pl.cdiv(batch, MAX_TILE_B)
    if num_tiles < 2 and batch >= 2 * MIN_TILE_B:
        num_tiles = 2
    tile_b = _round_up(pl.cdiv(batch, num_tiles), MIN_TILE_B)
    padded_batch = num_tiles * tile_b

    xp = x.astype(jnp.bfloat16)                    # bf16 streamed input
    if padded_batch != batch:
        xp = jnp.pad(xp, ((0, padded_batch - batch), (0, 0)))

    # resident operands: constant index_map -> loaded once, reused every step
    const2d = lambda a: pl.BlockSpec(a.shape, lambda i: (0, 0))

    flops = 2 * padded_batch * (input_dim * hidden_dim
                                + hidden_dim * hidden_dim
                                + hidden_dim * out_pad)
    bytes_accessed = (padded_batch * input_dim * 2            # streamed bf16 x
                      + padded_batch * out_pad * 2            # streamed bf16 out
                      + (w1b.size + w2b.size + w3b.size) * 2  # bf16 weights
                      + (b1f.size + b2f.size + b3f.size) * 4) # f32 biases

    out = pl.pallas_call(
        caddienet_kernel,
        out_shape=jax.ShapeDtypeStruct((padded_batch, out_pad), jnp.bfloat16),
        grid=(num_tiles,),
        in_specs=[
            pl.BlockSpec((tile_b, input_dim), lambda i: (i, 0)),  # streamed x
            const2d(w1b), const2d(b1f),
            const2d(w2b), const2d(b2f),
            const2d(w3b), const2d(b3f),
        ],
        out_specs=pl.BlockSpec((tile_b, out_pad), lambda i: (i, 0)),
        compiler_params=pltpu.CompilerParams(
            dimension_semantics=("parallel",),    # batch tiles -> 2 TCs on v7x
            vmem_limit_bytes=32 * 1024 * 1024,    # safe on v5e/v6e/v7x; ~5 MiB used
        ),
        cost_estimate=pl.CostEstimate(
            flops=flops, transcendentals=0, bytes_accessed=bytes_accessed),
    )(xp, w1b, b1f, w2b, b2f, w3b, b3f)

    return out[:batch, :output_dim].astype(jnp.float32)


def init_params(key, input_dim, hidden_dim=32, output_dim=10):
    """Deterministic init mimicking PyTorch Linear's uniform(-1/sqrt(fan_in), ...)."""
    def linear(k, fan_in, fan_out):
        kw, kb = jax.random.split(k)
        bound = 1.0 / jnp.sqrt(fan_in)
        # store W as (in, out) == W_pytorch.T so the kernel can do x @ W
        w = jax.random.uniform(kw, (fan_in, fan_out), jnp.float32, -bound, bound)
        b = jax.random.uniform(kb, (1, fan_out), jnp.float32, -bound, bound)
        return w, b

    k1, k2, k3 = jax.random.split(key, 3)
    w1, b1 = linear(k1, input_dim, hidden_dim)
    w2, b2 = linear(k2, hidden_dim, hidden_dim)
    w3, b3 = linear(k3, hidden_dim, output_dim)
    return {"w1": w1, "b1": b1, "w2": w2, "b2": b2, "w3": w3, "b3": b3}


if __name__ == "__main__":
    key = jax.random.PRNGKey(0)
    kx, kp = jax.random.split(key)

    batch, input_dim, hidden_dim, output_dim = 8, 16, 32, 10
    x = jax.random.normal(kx, (batch, input_dim), jnp.float32)
    params = init_params(kp, input_dim, hidden_dim, output_dim)

    prepped, out_dim = prepare_params(params)   # one-time bf16 cast + lane pad
    out = caddienet_forward(x, prepped, out_dim)
    jax.block_until_ready(out)

    # sanity check against plain-JAX f32 reference (bf16 activations/operands
    # and bf16 writeback -> loose tolerance)
    def ref(x, p):
        h1 = jnp.maximum(x @ p["w1"] + p["b1"], 0.0)
        h2 = jnp.maximum(h1 @ p["w2"] + p["b2"], 0.0)
        return h2 @ p["w3"] + p["b3"]

    expected = ref(x, params)
    assert out.shape == (batch, output_dim)
    assert jnp.allclose(out, expected, atol=5e-2, rtol=5e-2)

    print("KERNEL_OK")
</pallas_src>

<mosaic_0001>
module attributes {stable_mosaic.version = 11 : i64} {
  func.func @caddienet_kernel(%arg0: i32, %arg1: memref<16x16xbf16, #tpu.memory_space<vmem>>, %arg2: memref<16x32xbf16, #tpu.memory_space<vmem>>, %arg3: memref<1x32xf32, #tpu.memory_space<vmem>>, %arg4: memref<32x32xbf16, #tpu.memory_space<vmem>>, %arg5: memref<1x32xf32, #tpu.memory_space<vmem>>, %arg6: memref<32x128xbf16, #tpu.memory_space<vmem>>, %arg7: memref<1x128xf32, #tpu.memory_space<vmem>>, %arg8: memref<16x128xbf16, #tpu.memory_space<vmem>>) attributes {dimension_semantics = [#tpu.dimension_semantics<parallel>], iteration_bounds = array<i64: 1>, scalar_prefetch = 0 : i64, scratch_operands = 0 : i64, tpu.core_type = #tpu.core_type<tc>, window_params = [{transform_indices = @transform_0, window_bounds = array<i64: 16, 16>}, {pipeline_mode = #tpu.pipeline_mode<synchronous>, transform_indices = @transform_1, window_bounds = array<i64: 16, 32>}, {pipeline_mode = #tpu.pipeline_mode<synchronous>, transform_indices = @transform_2, window_bounds = array<i64: 1, 32>}, {pipeline_mode = #tpu.pipeline_mode<synchronous>, transform_indices = @transform_3, window_bounds = array<i64: 32, 32>}, {pipeline_mode = #tpu.pipeline_mode<synchronous>, transform_indices = @transform_4, window_bounds = array<i64: 1, 32>}, {pipeline_mode = #tpu.pipeline_mode<synchronous>, transform_indices = @transform_5, window_bounds = array<i64: 32, 128>}, {pipeline_mode = #tpu.pipeline_mode<synchronous>, transform_indices = @transform_6, window_bounds = array<i64: 1, 128>}, {transform_indices = @transform_7, window_bounds = array<i64: 16, 128>}]} {
    %c0 = arith.constant 0 : index
    %c0_0 = arith.constant 0 : index
    %0 = vector.load %arg1[%c0, %c0_0] : memref<16x16xbf16, #tpu.memory_space<vmem>>, vector<16x16xbf16>
    %c0_1 = arith.constant 0 : index
    %c0_2 = arith.constant 0 : index
    %1 = vector.load %arg2[%c0_1, %c0_2] : memref<16x32xbf16, #tpu.memory_space<vmem>>, vector<16x32xbf16>
    %cst = arith.constant dense<0.000000e+00> : vector<16x32xf32>
    %2 = tpu.matmul %0, %1, %cst {dimension_numbers = #tpu.dot_dimension_numbers<[1], [0], [0], [1], [0, 0, 1, 1], [], []>} : vector<16x16xbf16>, vector<16x32xbf16>, vector<16x32xf32> -> vector<16x32xf32>
    %c0_3 = arith.constant 0 : index
    %c0_4 = arith.constant 0 : index
    %3 = vector.load %arg3[%c0_3, %c0_4] : memref<1x32xf32, #tpu.memory_space<vmem>>, vector<1x32xf32>
    %4 = vector.broadcast %3 : vector<1x32xf32> to vector<16x32xf32>
    %5 = arith.addf %2, %4 : vector<16x32xf32>
    %cst_5 = arith.constant 0.000000e+00 : f32
    %6 = vector.broadcast %cst_5 : f32 to vector<16x32xf32>
    %7 = arith.maximumf %5, %6 : vector<16x32xf32>
    %8 = arith.truncf %7 : vector<16x32xf32> to vector<16x32xbf16>
    %c0_6 = arith.constant 0 : index
    %c0_7 = arith.constant 0 : index
    %9 = vector.load %arg4[%c0_6, %c0_7] : memref<32x32xbf16, #tpu.memory_space<vmem>>, vector<32x32xbf16>
    %cst_8 = arith.constant dense<0.000000e+00> : vector<16x32xf32>
    %10 = tpu.matmul %8, %9, %cst_8 {dimension_numbers = #tpu.dot_dimension_numbers<[1], [0], [0], [1], [0, 0, 1, 1], [], []>} : vector<16x32xbf16>, vector<32x32xbf16>, vector<16x32xf32> -> vector<16x32xf32>
    %c0_9 = arith.constant 0 : index
    %c0_10 = arith.constant 0 : index
    %11 = vector.load %arg5[%c0_9, %c0_10] : memref<1x32xf32, #tpu.memory_space<vmem>>, vector<1x32xf32>
    %12 = vector.broadcast %11 : vector<1x32xf32> to vector<16x32xf32>
    %13 = arith.addf %10, %12 : vector<16x32xf32>
    %cst_11 = arith.constant 0.000000e+00 : f32
    %14 = vector.broadcast %cst_11 : f32 to vector<16x32xf32>
    %15 = arith.maximumf %13, %14 : vector<16x32xf32>
    %16 = arith.truncf %15 : vector<16x32xf32> to vector<16x32xbf16>
    %c0_12 = arith.constant 0 : index
    %c0_13 = arith.constant 0 : index
    %17 = vector.load %arg6[%c0_12, %c0_13] : memref<32x128xbf16, #tpu.memory_space<vmem>>, vector<32x128xbf16>
    %cst_14 = arith.constant dense<0.000000e+00> : vector<16x128xf32>
    %18 = tpu.matmul %16, %17, %cst_14 {dimension_numbers = #tpu.dot_dimension_numbers<[1], [0], [0], [1], [0, 0, 1, 1], [], []>} : vector<16x32xbf16>, vector<32x128xbf16>, vector<16x128xf32> -> vector<16x128xf32>
    %c0_15 = arith.constant 0 : index
    %c0_16 = arith.constant 0 : index
    %19 = vector.load %arg7[%c0_15, %c0_16] : memref<1x128xf32, #tpu.memory_space<vmem>>, vector<1x128xf32>
    %20 = vector.broadcast %19 : vector<1x128xf32> to vector<16x128xf32>
    %21 = arith.addf %18, %20 : vector<16x128xf32>
    %22 = arith.truncf %21 : vector<16x128xf32> to vector<16x128xbf16>
    %c0_17 = arith.constant 0 : index
    %c0_18 = arith.constant 0 : index
    %23 = vector.load %arg8[%c0_17, %c0_18] : memref<16x128xbf16, #tpu.memory_space<vmem>>, vector<16x128xbf16>
    tpu.vector_store %arg8[%c0_17, %c0_18], %22 {strides = array<i32>} : memref<16x128xbf16, #tpu.memory_space<vmem>>, vector<16x128xbf16>,
    return
  }
  func.func @transform_0(%arg0: i32) -> (i32, i32) {
    %c0_i32 = arith.constant 0 : i32
    %c0_i32_0 = arith.constant 0 : i32
    return %arg0, %c0_i32 : i32, i32
  }
  func.func @transform_1(%arg0: i32) -> (i32, i32) {
    %c0_i32 = arith.constant 0 : i32
    %c0_i32_0 = arith.constant 0 : i32
    %c0_i32_1 = arith.constant 0 : i32
    return %c0_i32, %c0_i32_0 : i32, i32
  }
  func.func @transform_2(%arg0: i32) -> (i32, i32) {
    %c0_i32 = arith.constant 0 : i32
    %c0_i32_0 = arith.constant 0 : i32
    %c0_i32_1 = arith.constant 0 : i32
    return %c0_i32, %c0_i32_0 : i32, i32
  }
  func.func @transform_3(%arg0: i32) -> (i32, i32) {
    %c0_i32 = arith.constant 0 : i32
    %c0_i32_0 = arith.constant 0 : i32
    %c0_i32_1 = arith.constant 0 : i32
    return %c0_i32, %c0_i32_0 : i32, i32
  }
  func.func @transform_4(%arg0: i32) -> (i32, i32) {
    %c0_i32 = arith.constant 0 : i32
    %c0_i32_0 = arith.constant 0 : i32
    %c0_i32_1 = arith.constant 0 : i32
    return %c0_i32, %c0_i32_0 : i32, i32
  }
  func.func @transform_5(%arg0: i32) -> (i32, i32) {
    %c0_i32 = arith.constant 0 : i32
    %c0_i32_0 = arith.constant 0 : i32
    %c0_i32_1 = arith.constant 0 : i32
    return %c0_i32, %c0_i32_0 : i32, i32
  }
  func.func @transform_6(%arg0: i32) -> (i32, i32) {
    %c0_i32 = arith.constant 0 : i32
    %c0_i32_0 = arith.constant 0 : i32
    %c0_i32_1 = arith.constant 0 : i32
    return %c0_i32, %c0_i32_0 : i32, i32
  }
  func.func @transform_7(%arg0: i32) -> (i32, i32) {
    %c0_i32 = arith.constant 0 : i32
    %c0_i32_0 = arith.constant 0 : i32
    return %arg0, %c0_i32 : i32, i32
  }
}

</mosaic_0001>

<bundles_post_ra>
// kernel: caddienet_forward.1
= control target key start
LH: loop header
LB: loop body
LE: loop exit
PB: predicated region body
PF: predicated region fallthrough
CT: control target
= control target key end

     0   :  { %12 = vsyncpa [#allocation3], 0  ;;  %s522_s0 = inlined_call_operand.vmem [shape: bf16[16,16], index: 0, kind: input, shape index: {}]   ;;  %s523_s1 = inlined_call_operand.vmem [shape: bf16[16,32], index: 1, kind: input, shape index: {}]   ;;  %s524_s2 = inlined_call_operand.hbm [shape: f32[1,32], index: 2, kind: input, shape index: {}]   ;;  %s525_s3 = inlined_call_operand.vmem [shape: bf16[32,32], index: 3, kind: input, shape index: {}]   ;;  %s526_s4 = inlined_call_operand.hbm [shape: f32[1,32], index: 4, kind: input, shape index: {}]   ;;  %s527_s5 = inlined_call_operand.vmem [shape: bf16[32,128], index: 5, kind: input, shape index: {}]   ;;  %s528_s6 = inlined_call_operand.hbm [shape: f32[1,128], index: 6, kind: input, shape index: {}]   ;;  %s529_s7 = inlined_call_operand.vmem [shape: bf16[16,128], index: 7, kind: output, shape index: {}]  }
   0x1   :  { %13 = vsyncpa [#allocation5], 0  ;;  %s418_s24 = smov [#allocation4]   ;;  %s419_s26 = smov [#allocation2]  }
   0x2   :  { %s36_s25 = sshll.u32 %s418_s24, 4  ;;  %s24_s27 = sshll.u32 %s419_s26, 4  ;;  %s37_s25 = int_to_ptr.vmem [resolvable:$true] %s36_s25  ;;  %s25_s27 = int_to_ptr.vmem [resolvable:$true] %s24_s27 }
   0x3   :  { %s348_s30 = scalar_lea.hbm %s526_s4, 16 }
   0x4   :  { %p349_p0 = scmp.ne.s32.totalorder %s526_s4, %s348_s30  ;;  %p352_p1 = scmp.lt.u32.totalorder %s348_s30, %s526_s4 }
   0x6   :  { %p354_p2 = pnand %p352_p1, %p349_p0 }
   0x8   :  { %357 = shalt.err (!%p354_p2)
}
   0x9   :  { %s358_s12 = scalar_lea.vmem %s37_s25, 16  ;;  %s362_s13 = scalar_lea.vmem %s37_s25, 32 }
   0xa   :  { %p359_p3 = scmp.ne.s32.totalorder %s37_s25, %s358_s12  ;;  %p363_p4 = scmp.lt.s32.totalorder %s37_s25, %s37_s25 }
   0xb   :  { %p364_p5 = scmp.lt.s32.totalorder %s362_s13, %s358_s12 }
   0xd   :  { %p365_p6 = por %p364_p5, %p363_p4 }
   0xf   :  { %p366_p7 = pnand %p365_p6, %p359_p3 }
  0x11   :  { %369 = shalt.err (!%p366_p7)
}
  0x12   :  { %39 = dma.hbm_to_vmem [thread:$0]  %s526_s4, 16, %s37_s25, [#allocation5]  }
  0x13   :  { %s370_s18 = scalar_lea.hbm %s524_s2, 16 }
  0x14   :  { %p371_p8 = scmp.ne.s32.totalorder %s524_s2, %s370_s18  ;;  %p374_p9 = scmp.lt.u32.totalorder %s370_s18, %s524_s2 }
  0x16   :  { %p376_p10 = pnand %p374_p9, %p371_p8 }
  0x18   :  { %379 = shalt.err (!%p376_p10)
}
  0x19   :  { %s380_s23 = scalar_lea.vmem %s25_s27, 16  ;;  %s384_s24 = scalar_lea.vmem %s25_s27, 32 }
  0x1a   :  { %p381_p11 = scmp.ne.s32.totalorder %s25_s27, %s380_s23  ;;  %p385_p12 = scmp.lt.s32.totalorder %s25_s27, %s25_s27 }
  0x1b   :  { %p386_p13 = scmp.lt.s32.totalorder %s384_s24, %s380_s23 }
  0x1d   :  { %p387_p0 = por %p386_p13, %p385_p12 }
  0x1f   :  { %p388_p1 = pnand %p387_p0, %p381_p11 }
  0x21   :  { %391 = shalt.err (!%p388_p1)
}
  0x22   :  { %27 = dma.hbm_to_vmem [thread:$0]  %s524_s2, 16, %s25_s27, [#allocation3]  }
  0x23   :  { %s420_s26 = smov [#allocation6]   ;;  %s392_s8 = scalar_lea.hbm %s528_s6, 16 }
  0x24   :  { %s48_s28 = sshll.u32 %s420_s26, 4  ;;  %p393_p2 = scmp.ne.s32.totalorder %s528_s6, %s392_s8  ;;  %s49_s28 = int_to_ptr.vmem [resolvable:$true] %s48_s28 }
  0x25   :  { %p396_p3 = scmp.lt.u32.totalorder %s392_s8, %s528_s6 }
  0x27   :  { %p398_p4 = pnand %p396_p3, %p393_p2 }
  0x29   :  { %401 = shalt.err (!%p398_p4)
}
  0x2a   :  { %s402_s13 = scalar_lea.vmem %s49_s28, 16  ;;  %s406_s2 = scalar_lea.vmem %s49_s28, 32 }
  0x2b   :  { %p403_p5 = scmp.ne.s32.totalorder %s49_s28, %s402_s13  ;;  %p407_p6 = scmp.lt.s32.totalorder %s49_s28, %s49_s28 }
  0x2c   :  { %p408_p7 = scmp.lt.s32.totalorder %s406_s2, %s402_s13 }
  0x2e   :  { %p409_p8 = por %p408_p7, %p407_p6 }
  0x30   :  { %p410_p9 = pnand %p409_p8, %p403_p5 }
  0x32   :  { %413 = shalt.err (!%p410_p9)
}
  0x33   :  { %51 = dma.hbm_to_vmem [thread:$0]  %s528_s6, 16, %s49_s28, [#allocation5]  }
  0x34   :  { %414 = dma.done.wait [#allocation3], 16  }
  0x35   :  { %415 = vsyncadd [#allocation3], 4294967280 }
  0x36   :  { %416 = dma.done.wait [#allocation5], 32  }
  0x37   :  { %417 = vsyncadd [#allocation5], 4294967264  ;;  %v421_v0 = vmov 0.0   ;;  %vm422_vm0 = vmmov 0   ;;  %v342_v1 = vld [vmem:[%s523_s1] sm:$0xff]   ;;  %vm84_vm1 = vcmask 130048  }
  0x38   :  { %315 = vmatprep.subr.bf16.mxu0 %v421_v0  ;;  %317 = vmatprep.mubr.msk.bf16.mxu0 %vm422_vm0, %v421_v0  ;;  %v343_v2 = vld [vmem:[%s522_s0] sm:$0xff]   ;;  %v345_v4 = vld [vmem:[%s525_s3 + $0x8] sm:$0xff]   ;;  %vm155_vm2 = vcmask 261120  }
  0x39   :  { %321 = vmatprep.subr.bf16.mxu1 %v421_v0  ;;  %325 = vmatprep.mubr.msk.bf16.mxu1 %vm422_vm0, %v421_v0  ;;  %v344_v3 = vld [vmem:[%s525_s3] sm:$0xff]   ;;  %v347_v16 = vld [vmem:[%s527_s5 + $0x8] sm:$0xff]  }
  0x3a   :  { %316 = vmatpush3.bf16.msra.mxu0 %v342_v1  ;;  %322 = vmatpush3.bf16.msra.mxu1 %v344_v3  ;;  %v286_v5 = vld [vmem:[#allocation2] ss:$0 sm:$0xff]  ;;  %v290_v17 = vld [vmem:[#allocation4] ss:$0 sm:$0xff]  ;;  %v294_v27 = vld [vmem:[#allocation6] ss:$0 sm:$0xff] }
  0x3b   :  { %329 = vmatprep.subr.bf16.mxu0 %v421_v0  ;;  %323 = vmatprep.subr.bf16.mxu1 %v421_v0  ;;  %v346_v15 = vld [vmem:[%s527_s5] sm:$0xff]  }
  0x3d   :  { %318 = vmatmul.mubr.msk.bf16.vlgmr.msra.gmra.mrb[0].mxu0 %vm84_vm1, %v343_v2 }
  0x3e   :  { %333 = vmatprep.mubr.msk.bf16.mxu0 %vm422_vm0, %v421_v0  ;;  %324 = vmatpush3.bf16.msra.mxu1 %v345_v4 }
  0x3f   :  { %330 = vmatpush3.bf16.msra.mxu0 %v346_v15 }
  0x40   :  { %331 = vmatprep.subr.bf16.mxu0 %v421_v0 }
  0x43   :  { %332 = vmatpush3.bf16.msra.mxu0 %v347_v16 }
 0x110   :  { %v122_v6 = vpop.f32.mrb[0].mxu0 }
 0x111   :  { %v123_v7 = vadd.f32 %v286_v5, %v122_v6  ;;  %v319_v8 = vpop.f32.mrb[1].mxu0 }
 0x112   :  { %v125_v9 = vpop.f32.mrb[2].mxu0 }
 0x113   :  { %v126_v10 = vadd.f32 %v286_v5, %v125_v9  ;;  %v320_v11 = vpop.f32.mrb[3].mxu0  ;;  %v129_v12 = vmax.f32 %v123_v7, 0.0 }
 0x115   :  { %v130_v13 = vmax.f32 %v126_v10, 0.0 }
 0x117   :  { %v131_v14 = vpack.c.bf16 %v130_v13, %v129_v12 }
 0x119   :  { %326 = vmatmul.mubr.msk.bf16.vlgmr.msra.gmra.mrb[0].mxu1 %vm155_vm2, %v131_v14 }
 0x1ec   :  { %v193_v18 = vpop.f32.mrb[0].mxu1 }
 0x1ed   :  { %v194_v19 = vadd.f32 %v290_v17, %v193_v18  ;;  %v327_v20 = vpop.f32.mrb[1].mxu1 }
 0x1ee   :  { %v196_v21 = vpop.f32.mrb[2].mxu1 }
 0x1ef   :  { %v197_v22 = vadd.f32 %v290_v17, %v196_v21  ;;  %v328_v23 = vpop.f32.mrb[3].mxu1  ;;  %v200_v24 = vmax.f32 %v194_v19, 0.0 }
 0x1f1   :  { %v201_v25 = vmax.f32 %v197_v22, 0.0 }
 0x1f3   :  { %v202_v26 = vpack.c.bf16 %v201_v25, %v200_v24 }
 0x1f5   :  { %334 = vmatmul.mubr.msk.bf16.vlgmr.msra.gmra.mrb[4].mxu0 %vm155_vm2, %v202_v26 }
 0x2c8   :  { %v263_v28 = vpop.f32.mrb[4].mxu0 }
 0x2c9   :  { %v335_v29 = vpop.f32.mrb[5].mxu0  ;;  %v264_v31 = vadd.f32 %v294_v27, %v263_v28 }
 0x2ca   :  { %v266_v30 = vpop.f32.mrb[6].mxu0 }
 0x2cb   :  { %v267_v32 = vadd.f32 %v294_v27, %v266_v30  ;;  %v336_v33 = vpop.f32.mrb[7].mxu0 }
 0x2cd   :  { %v305_v34 = vpack.c.bf16 %v267_v32, %v264_v31 }
 0x2cf   :  { %306 = vst [vmem:[%s529_s7] sm:$0xff] %v305_v34  }
 0x2d0   :  { %284 = vsyncpa [#allocation3], 1 }
 0x2d1   :  { %285 = vsyncpa [#allocation5], 1 }

</bundles_post_ra>
